<compile_context>
chip_gen: v6e
topology: v6e:2x2x1
jax: 0.10.0
libtpu: 0.0.40
codegen_flags: <defaults>
</compile_context>

<pallas_src>
import functools

import jax
import jax.numpy as jnp
from jax import lax
from jax.experimental import pallas as pl
from jax.experimental.pallas import tpu as pltpu


def _round_up(x, m):
    return ((x + m - 1) // m) * m


def _sparse_mlp_kernel(x_ref, w1_ref, b1_ref, w2_ref, b2_ref, o_ref, h_acc_ref,
                       *, sparsity, out_c):
    k = pl.program_id(1)

    # First Linear: accumulate x @ w1 over the K grid axis (bf16 MXU, f32 acc).
    @pl.when(k == 0)
    def _():
        h_acc_ref[...] = jnp.zeros_like(h_acc_ref)

    h_acc_ref[...] += jnp.dot(x_ref[...], w1_ref[...],
                              preferred_element_type=jnp.float32)

    # Epilogue on the last K step: tanh, second Linear, per-row top-k mask.
    @pl.when(k == pl.num_programs(1) - 1)
    def _():
        h = jnp.tanh(h_acc_ref[...] + b1_ref[...])
        out = jnp.dot(h.astype(w2_ref.dtype), w2_ref[...],
                      preferred_element_type=jnp.float32) + b2_ref[...]

        n_pad = out.shape[1]
        col_idx = lax.broadcasted_iota(jnp.int32, out.shape, 1)
        neg_big = jnp.float32(-3.4e38)  # sentinel; assumes no -inf activations
        # Padded lanes must never win the top-k selection.
        vals = jnp.where(col_idx < out_c, out, neg_big)
        keep = jnp.zeros(out.shape, jnp.bool_)

        # Iterative top-k selection, statically unrolled (sparsity is small and
        # a compile-time constant). Ties break toward the smallest column index
        # so exactly `sparsity` entries survive per row (topk + scatter).
        # Note: 2 cross-lane reductions per iteration (XLU is the saturating
        # unit of this epilogue); kept exact rather than packing value+column.
        for _ in range(sparsity):
            row_max = jnp.max(vals, axis=1, keepdims=True)
            is_max = vals == row_max
            sel_col = jnp.min(jnp.where(is_max, col_idx, n_pad),
                              axis=1, keepdims=True)
            sel = col_idx == sel_col
            keep = jnp.logical_or(keep, sel)
            vals = jnp.where(sel, neg_big, vals)

        o_ref[...] = jnp.where(keep, out, 0.0).astype(o_ref.dtype)


def _choose_tiles(batch, in_p, hid_p, out_p, budget_bytes):
    """Pick (TM, TK, padded_batch) so resident + double-buffered tiles fit VMEM."""
    bf16, f32 = 2, 4

    def estimate(tm, tk):
        dma = (2 * tm * tk * bf16            # x tile (double-buffered)
               + 2 * tk * hid_p * bf16       # w1 tile
               + 2 * hid_p * out_p * bf16    # w2 (VMEM-resident, 2 buffers)
               + 2 * (hid_p + out_p) * f32   # biases
               + 2 * tm * out_p * f32)       # output tile
        scratch = tm * hid_p * f32           # hidden accumulator
        live = tm * (hid_p + 4 * out_p) * f32  # tanh / top-k temporaries
        return dma + scratch + live

    tm_cands = [t for t in (512, 256, 128, 64, 32, 16, 8) if t < batch]
    if batch <= 512:
        tm_cands = [batch] + tm_cands        # a full-batch block is always legal
    tk_cands = [t for t in (2048, 1024, 512, 256, 128) if in_p % t == 0]
    if not tk_cands:
        tk_cands = [in_p]

    for tm in tm_cands:
        for tk in tk_cands:
            if estimate(tm, tk) <= budget_bytes:
                return tm, tk, _round_up(batch, tm)

    tm = min(batch, 8)
    return tm, tk_cands[-1], _round_up(batch, tm)


def _pad2(a, rows, cols, dtype):
    a = a.astype(dtype)
    return jnp.pad(a, ((0, rows - a.shape[0]), (0, cols - a.shape[1])))


def sparse_mlp_forward(x_nchw, w1, b1, w2, b2, *, sparsity):
    """x_nchw: (B,C,H,W) f32. w1:(in,hid), w2:(hid,out) pre-transposed; biases 1-D.
    Returns (B, out_channels) f32 with exactly `sparsity` nonzeros per row."""
    B = x_nchw.shape[0]
    x = x_nchw.reshape(B, -1)                # == torch x.view(x.size(0), -1)
    in_c, hid_c = w1.shape
    out_c = w2.shape[1]
    assert x.shape[1] == in_c
    assert 0 < sparsity <= out_c

    # Lane-dense padding: every feature dim to a multiple of 128.
    in_p = _round_up(in_c, 128)
    hid_p = _round_up(hid_c, 128)
    out_p = _round_up(out_c, 128)

    # VMEM-aware tile sizing (v7x has 64 MiB/TC vs 128 MiB on v5e/v6e).
    try:
        vmem_cap = int(pltpu.get_tpu_info().vmem_capacity_bytes)
    except Exception:
        vmem_cap = 64 * 1024 * 1024
    vmem_limit = min((vmem_cap * 3) // 4, 100 * 1024 * 1024)
    TM, TK, Bp = _choose_tiles(B, in_p, hid_p, out_p, int(vmem_limit * 0.8))

    # Pad + cast matmul operands (bf16 inputs, f32 accumulation/bias/top-k).
    xb = _pad2(x, Bp, in_p, jnp.bfloat16)
    w1b = _pad2(w1, in_p, hid_p, jnp.bfloat16)
    w2b = _pad2(w2, hid_p, out_p, jnp.bfloat16)
    b1p = _pad2(jnp.reshape(b1, (1, -1)), 1, hid_p, jnp.float32)
    b2p = _pad2(jnp.reshape(b2, (1, -1)), 1, out_p, jnp.float32)

    kernel = functools.partial(_sparse_mlp_kernel, sparsity=sparsity, out_c=out_c)

    out_padded = pl.pallas_call(
        kernel,
        out_shape=jax.ShapeDtypeStruct((Bp, out_p), jnp.float32),
        grid_spec=pltpu.PrefetchScalarGridSpec(
            num_scalar_prefetch=0,
            grid=(Bp // TM, in_p // TK),
            in_specs=[
                pl.BlockSpec((TM, TK), lambda i, k: (i, k)),        # x tile
                pl.BlockSpec((TK, hid_p), lambda i, k: (k, 0)),     # w1 tile
                pl.BlockSpec((1, hid_p), lambda i, k: (0, 0)),      # b1 (resident)
                pl.BlockSpec((hid_p, out_p), lambda i, k: (0, 0)),  # w2 (resident)
                pl.BlockSpec((1, out_p), lambda i, k: (0, 0)),      # b2 (resident)
            ],
            out_specs=pl.BlockSpec((TM, out_p), lambda i, k: (i, 0)),
            scratch_shapes=[pltpu.VMEM((TM, hid_p), jnp.float32)],
        ),
        compiler_params=pltpu.CompilerParams(
            dimension_semantics=("parallel", "arbitrary"),
            vmem_limit_bytes=vmem_limit,
        ),
    )(xb, w1b, b1p, w2b, b2p)

    return out_padded[:B, :out_c]


def _reference(x_nchw, w1, b1, w2, b2, sparsity):
    # Same math as the kernel (bf16 matmul inputs, f32 accumulation), with the
    # "keep everything >= k-th largest" top-k thresholding.
    x = x_nchw.reshape(x_nchw.shape[0], -1)
    h = jnp.tanh(
        jnp.dot(x.astype(jnp.bfloat16), w1.astype(jnp.bfloat16),
                preferred_element_type=jnp.float32) + jnp.reshape(b1, (1, -1)))
    out = jnp.dot(h.astype(jnp.bfloat16), w2.astype(jnp.bfloat16),
                  preferred_element_type=jnp.float32) + jnp.reshape(b2, (1, -1))
    kth = jnp.sort(out, axis=1)[:, -sparsity][:, None]
    return jnp.where(out >= kth, out, 0.0)


if __name__ == "__main__":
    # Small shapes consistent with the module:
    #   feature map (B=2, C=4, H=8, W=8) -> in_channels = 256
    #   hid_channels = 32, out_channels = 32, sparsity = 8
    B, C, H, W = 2, 4, 8, 8
    in_channels = C * H * W
    hid_channels = 32
    out_channels = 32
    sparsity = 8

    key = jax.random.PRNGKey(0)
    kx, k1, kb1, k2, kb2 = jax.random.split(key, 5)

    x = jax.random.normal(kx, (B, C, H, W), dtype=jnp.float32)
    # nn.Linear-style params, weights stored pre-transposed as (in, out).
    w1 = 0.01 * jax.random.normal(k1, (in_channels, hid_channels), jnp.float32)
    b1 = 0.01 * jax.random.normal(kb1, (hid_channels,), jnp.float32)
    w2 = 0.01 * jax.random.normal(k2, (hid_channels, out_channels), jnp.float32)
    b2 = 0.01 * jax.random.normal(kb2, (out_channels,), jnp.float32)

    out = sparse_mlp_forward(x, w1, b1, w2, b2, sparsity=sparsity)
    out = jax.block_until_ready(out)
    ref = _reference(x, w1, b1, w2, b2, sparsity)

    assert out.shape == (B, out_channels)
    # exactly `sparsity` surviving values per row (topk + scatter semantics)
    assert int(jnp.count_nonzero(out)) == B * sparsity
    assert jnp.allclose(out, ref, atol=1e-4, rtol=1e-3), float(
        jnp.max(jnp.abs(out - ref)))

    print("KERNEL_OK")
</pallas_src>

<mosaic_0001>
module attributes {stable_mosaic.version = 11 : i64} {
  func.func @_sparse_mlp_kernel(%arg0: i32, %arg1: i32, %arg2: memref<2x256xbf16, #tpu.memory_space<vmem>>, %arg3: memref<256x128xbf16, #tpu.memory_space<vmem>>, %arg4: memref<1x128xf32, #tpu.memory_space<vmem>>, %arg5: memref<128x128xbf16, #tpu.memory_space<vmem>>, %arg6: memref<1x128xf32, #tpu.memory_space<vmem>>, %arg7: memref<2x128xf32, #tpu.memory_space<vmem>>, %arg8: memref<2x128xf32, #tpu.memory_space<vmem>>) attributes {dimension_semantics = [#tpu.dimension_semantics<parallel>, #tpu.dimension_semantics<arbitrary>], iteration_bounds = array<i64: 1, 1>, scalar_prefetch = 0 : i64, scratch_operands = 1 : i64, tpu.core_type = #tpu.core_type<tc>, window_params = [{transform_indices = @transform_0, window_bounds = array<i64: 2, 256>}, {transform_indices = @transform_1, window_bounds = array<i64: 256, 128>}, {pipeline_mode = #tpu.pipeline_mode<synchronous>, transform_indices = @transform_2, window_bounds = array<i64: 1, 128>}, {pipeline_mode = #tpu.pipeline_mode<synchronous>, transform_indices = @transform_3, window_bounds = array<i64: 128, 128>}, {pipeline_mode = #tpu.pipeline_mode<synchronous>, transform_indices = @transform_4, window_bounds = array<i64: 1, 128>}, {transform_indices = @transform_5, window_bounds = array<i64: 2, 128>}]} {
    %c0_i32 = arith.constant 0 : i32
    %0 = arith.cmpi eq, %arg1, %c0_i32 : i32
    %1 = arith.extui %0 : i1 to i32
    %c0_i32_0 = arith.constant 0 : i32
    %2 = arith.cmpi ne, %1, %c0_i32_0 : i32
    scf.if %2 {
      %cst_10 = arith.constant 0.000000e+00 : f32
      %12 = vector.broadcast %cst_10 : f32 to vector<2x128xf32>
      %c0_11 = arith.constant 0 : index
      %c0_12 = arith.constant 0 : index
      %13 = vector.load %arg8[%c0_11, %c0_12] : memref<2x128xf32, #tpu.memory_space<vmem>>, vector<2x128xf32>
      tpu.vector_store %arg8[%c0_11, %c0_12], %12 {strides = array<i32>} : memref<2x128xf32, #tpu.memory_space<vmem>>, vector<2x128xf32>,
    } else {
    }
    %c0 = arith.constant 0 : index
    %c0_1 = arith.constant 0 : index
    %3 = vector.load %arg8[%c0, %c0_1] : memref<2x128xf32, #tpu.memory_space<vmem>>, vector<2x128xf32>
    %c0_2 = arith.constant 0 : index
    %c0_3 = arith.constant 0 : index
    %4 = vector.load %arg2[%c0_2, %c0_3] : memref<2x256xbf16, #tpu.memory_space<vmem>>, vector<2x256xbf16>
    %c0_4 = arith.constant 0 : index
    %c0_5 = arith.constant 0 : index
    %5 = vector.load %arg3[%c0_4, %c0_5] : memref<256x128xbf16, #tpu.memory_space<vmem>>, vector<256x128xbf16>
    %cst = arith.constant dense<0.000000e+00> : vector<2x128xf32>
    %6 = tpu.matmul %4, %5, %cst {dimension_numbers = #tpu.dot_dimension_numbers<[1], [0], [0], [1], [0, 0, 1, 1], [], []>} : vector<2x256xbf16>, vector<256x128xbf16>, vector<2x128xf32> -> vector<2x128xf32>
    %7 = arith.addf %3, %6 : vector<2x128xf32>
    %c0_6 = arith.constant 0 : index
    %c0_7 = arith.constant 0 : index
    %8 = vector.load %arg8[%c0_6, %c0_7] : memref<2x128xf32, #tpu.memory_space<vmem>>, vector<2x128xf32>
    tpu.vector_store %arg8[%c0_6, %c0_7], %7 {strides = array<i32>} : memref<2x128xf32, #tpu.memory_space<vmem>>, vector<2x128xf32>,
    %c0_i32_8 = arith.constant 0 : i32
    %9 = arith.cmpi eq, %arg1, %c0_i32_8 : i32
    %10 = arith.extui %9 : i1 to i32
    %c0_i32_9 = arith.constant 0 : i32
    %11 = arith.cmpi ne, %10, %c0_i32_9 : i32
    scf.if %11 {
      %c0_10 = arith.constant 0 : index
      %c0_11 = arith.constant 0 : index
      %12 = vector.load %arg8[%c0_10, %c0_11] : memref<2x128xf32, #tpu.memory_space<vmem>>, vector<2x128xf32>
      %c0_12 = arith.constant 0 : index
      %c0_13 = arith.constant 0 : index
      %13 = vector.load %arg4[%c0_12, %c0_13] : memref<1x128xf32, #tpu.memory_space<vmem>>, vector<1x128xf32>
      %14 = vector.broadcast %13 : vector<1x128xf32> to vector<2x128xf32>
      %15 = arith.addf %12, %14 : vector<2x128xf32>
      %16 = math.tanh %15 : vector<2x128xf32>
      %17 = arith.truncf %16 : vector<2x128xf32> to vector<2x128xbf16>
      %c0_14 = arith.constant 0 : index
      %c0_15 = arith.constant 0 : index
      %18 = vector.load %arg5[%c0_14, %c0_15] : memref<128x128xbf16, #tpu.memory_space<vmem>>, vector<128x128xbf16>
      %cst_16 = arith.constant dense<0.000000e+00> : vector<2x128xf32>
      %19 = tpu.matmul %17, %18, %cst_16 {dimension_numbers = #tpu.dot_dimension_numbers<[1], [0], [0], [1], [0, 0, 1, 1], [], []>} : vector<2x128xbf16>, vector<128x128xbf16>, vector<2x128xf32> -> vector<2x128xf32>
      %c0_17 = arith.constant 0 : index
      %c0_18 = arith.constant 0 : index
      %20 = vector.load %arg6[%c0_17, %c0_18] : memref<1x128xf32, #tpu.memory_space<vmem>>, vector<1x128xf32>
      %21 = vector.broadcast %20 : vector<1x128xf32> to vector<2x128xf32>
      %22 = arith.addf %19, %21 : vector<2x128xf32>
      %23 = tpu.iota {dimensions = array<i32: 1>} : vector<2x128xi32>
      %c32_i32 = arith.constant 32 : i32
      %24 = vector.broadcast %c32_i32 : i32 to vector<2x128xi32>
      %25 = arith.cmpi slt, %23, %24 : vector<2x128xi32>
      %cst_19 = arith.constant -3.400000e+38 : f32
      %26 = vector.broadcast %cst_19 : f32 to vector<2x128xf32>
      %27 = arith.select %25, %22, %26 : vector<2x128xi1>, vector<2x128xf32>
      %false = arith.constant false
      %28 = vector.broadcast %false : i1 to vector<2x128xi1>
      %cst_20 = arith.constant dense<0xFF800000> : vector<2xf32>
      %29 = vector.multi_reduction <maximumf>, %27, %cst_20 [1] : vector<2x128xf32> to vector<2xf32>
      %30 = vector.shape_cast %29 : vector<2xf32> to vector<2x1xf32>
      %31 = vector.broadcast %30 : vector<2x1xf32> to vector<2x128xf32>
      %32 = arith.cmpf oeq, %27, %31 : vector<2x128xf32>
      %c128_i32 = arith.constant 128 : i32
      %33 = vector.broadcast %c128_i32 : i32 to vector<2x128xi32>
      %34 = arith.select %32, %23, %33 : vector<2x128xi1>, vector<2x128xi32>
      %cst_21 = arith.constant dense<2147483647> : vector<2xi32>
      %35 = vector.multi_reduction <minsi>, %34, %cst_21 [1] : vector<2x128xi32> to vector<2xi32>
      %36 = vector.shape_cast %35 : vector<2xi32> to vector<2x1xi32>
      %37 = vector.broadcast %36 : vector<2x1xi32> to vector<2x128xi32>
      %38 = arith.cmpi eq, %23, %37 : vector<2x128xi32>
      %39 = arith.ori %28, %38 : vector<2x128xi1>
      %cst_22 = arith.constant -3.400000e+38 : f32
      %40 = vector.broadcast %cst_22 : f32 to vector<2x128xf32>
      %41 = arith.select %38, %40, %27 : vector<2x128xi1>, vector<2x128xf32>
      %cst_23 = arith.constant dense<0xFF800000> : vector<2xf32>
      %42 = vector.multi_reduction <maximumf>, %41, %cst_23 [1] : vector<2x128xf32> to vector<2xf32>
      %43 = vector.shape_cast %42 : vector<2xf32> to vector<2x1xf32>
      %44 = vector.broadcast %43 : vector<2x1xf32> to vector<2x128xf32>
      %45 = arith.cmpf oeq, %41, %44 : vector<2x128xf32>
      %c128_i32_24 = arith.constant 128 : i32
      %46 = vector.broadcast %c128_i32_24 : i32 to vector<2x128xi32>
      %47 = arith.select %45, %23, %46 : vector<2x128xi1>, vector<2x128xi32>
      %cst_25 = arith.constant dense<2147483647> : vector<2xi32>
      %48 = vector.multi_reduction <minsi>, %47, %cst_25 [1] : vector<2x128xi32> to vector<2xi32>
      %49 = vector.shape_cast %48 : vector<2xi32> to vector<2x1xi32>
      %50 = vector.broadcast %49 : vector<2x1xi32> to vector<2x128xi32>
      %51 = arith.cmpi eq, %23, %50 : vector<2x128xi32>
      %52 = arith.ori %39, %51 : vector<2x128xi1>
      %cst_26 = arith.constant -3.400000e+38 : f32
      %53 = vector.broadcast %cst_26 : f32 to vector<2x128xf32>
      %54 = arith.select %51, %53, %41 : vector<2x128xi1>, vector<2x128xf32>
      %cst_27 = arith.constant dense<0xFF800000> : vector<2xf32>
      %55 = vector.multi_reduction <maximumf>, %54, %cst_27 [1] : vector<2x128xf32> to vector<2xf32>
      %56 = vector.shape_cast %55 : vector<2xf32> to vector<2x1xf32>
      %57 = vector.broadcast %56 : vector<2x1xf32> to vector<2x128xf32>
      %58 = arith.cmpf oeq, %54, %57 : vector<2x128xf32>
      %c128_i32_28 = arith.constant 128 : i32
      %59 = vector.broadcast %c128_i32_28 : i32 to vector<2x128xi32>
      %60 = arith.select %58, %23, %59 : vector<2x128xi1>, vector<2x128xi32>
      %cst_29 = arith.constant dense<2147483647> : vector<2xi32>
      %61 = vector.multi_reduction <minsi>, %60, %cst_29 [1] : vector<2x128xi32> to vector<2xi32>
      %62 = vector.shape_cast %61 : vector<2xi32> to vector<2x1xi32>
      %63 = vector.broadcast %62 : vector<2x1xi32> to vector<2x128xi32>
      %64 = arith.cmpi eq, %23, %63 : vector<2x128xi32>
      %65 = arith.ori %52, %64 : vector<2x128xi1>
      %cst_30 = arith.constant -3.400000e+38 : f32
      %66 = vector.broadcast %cst_30 : f32 to vector<2x128xf32>
      %67 = arith.select %64, %66, %54 : vector<2x128xi1>, vector<2x128xf32>
      %cst_31 = arith.constant dense<0xFF800000> : vector<2xf32>
      %68 = vector.multi_reduction <maximumf>, %67, %cst_31 [1] : vector<2x128xf32> to vector<2xf32>
      %69 = vector.shape_cast %68 : vector<2xf32> to vector<2x1xf32>
      %70 = vector.broadcast %69 : vector<2x1xf32> to vector<2x128xf32>
      %71 = arith.cmpf oeq, %67, %70 : vector<2x128xf32>
      %c128_i32_32 = arith.constant 128 : i32
      %72 = vector.broadcast %c128_i32_32 : i32 to vector<2x128xi32>
      %73 = arith.select %71, %23, %72 : vector<2x128xi1>, vector<2x128xi32>
      %cst_33 = arith.constant dense<2147483647> : vector<2xi32>
      %74 = vector.multi_reduction <minsi>, %73, %cst_33 [1] : vector<2x128xi32> to vector<2xi32>
      %75 = vector.shape_cast %74 : vector<2xi32> to vector<2x1xi32>
      %76 = vector.broadcast %75 : vector<2x1xi32> to vector<2x128xi32>
      %77 = arith.cmpi eq, %23, %76 : vector<2x128xi32>
      %78 = arith.ori %65, %77 : vector<2x128xi1>
      %cst_34 = arith.constant -3.400000e+38 : f32
      %79 = vector.broadcast %cst_34 : f32 to vector<2x128xf32>
      %80 = arith.select %77, %79, %67 : vector<2x128xi1>, vector<2x128xf32>
      %cst_35 = arith.constant dense<0xFF800000> : vector<2xf32>
      %81 = vector.multi_reduction <maximumf>, %80, %cst_35 [1] : vector<2x128xf32> to vector<2xf32>
      %82 = vector.shape_cast %81 : vector<2xf32> to vector<2x1xf32>
      %83 = vector.broadcast %82 : vector<2x1xf32> to vector<2x128xf32>
      %84 = arith.cmpf oeq, %80, %83 : vector<2x128xf32>
      %c128_i32_36 = arith.constant 128 : i32
      %85 = vector.broadcast %c128_i32_36 : i32 to vector<2x128xi32>
      %86 = arith.select %84, %23, %85 : vector<2x128xi1>, vector<2x128xi32>
      %cst_37 = arith.constant dense<2147483647> : vector<2xi32>
      %87 = vector.multi_reduction <minsi>, %86, %cst_37 [1] : vector<2x128xi32> to vector<2xi32>
      %88 = vector.shape_cast %87 : vector<2xi32> to vector<2x1xi32>
      %89 = vector.broadcast %88 : vector<2x1xi32> to vector<2x128xi32>
      %90 = arith.cmpi eq, %23, %89 : vector<2x128xi32>
      %91 = arith.ori %78, %90 : vector<2x128xi1>
      %cst_38 = arith.constant -3.400000e+38 : f32
      %92 = vector.broadcast %cst_38 : f32 to vector<2x128xf32>
      %93 = arith.select %90, %92, %80 : vector<2x128xi1>, vector<2x128xf32>
      %cst_39 = arith.constant dense<0xFF800000> : vector<2xf32>
      %94 = vector.multi_reduction <maximumf>, %93, %cst_39 [1] : vector<2x128xf32> to vector<2xf32>
      %95 = vector.shape_cast %94 : vector<2xf32> to vector<2x1xf32>
      %96 = vector.broadcast %95 : vector<2x1xf32> to vector<2x128xf32>
      %97 = arith.cmpf oeq, %93, %96 : vector<2x128xf32>
      %c128_i32_40 = arith.constant 128 : i32
      %98 = vector.broadcast %c128_i32_40 : i32 to vector<2x128xi32>
      %99 = arith.select %97, %23, %98 : vector<2x128xi1>, vector<2x128xi32>
      %cst_41 = arith.constant dense<2147483647> : vector<2xi32>
      %100 = vector.multi_reduction <minsi>, %99, %cst_41 [1] : vector<2x128xi32> to vector<2xi32>
      %101 = vector.shape_cast %100 : vector<2xi32> to vector<2x1xi32>
      %102 = vector.broadcast %101 : vector<2x1xi32> to vector<2x128xi32>
      %103 = arith.cmpi eq, %23, %102 : vector<2x128xi32>
      %104 = arith.ori %91, %103 : vector<2x128xi1>
      %cst_42 = arith.constant -3.400000e+38 : f32
      %105 = vector.broadcast %cst_42 : f32 to vector<2x128xf32>
      %106 = arith.select %103, %105, %93 : vector<2x128xi1>, vector<2x128xf32>
      %cst_43 = arith.constant dense<0xFF800000> : vector<2xf32>
      %107 = vector.multi_reduction <maximumf>, %106, %cst_43 [1] : vector<2x128xf32> to vector<2xf32>
      %108 = vector.shape_cast %107 : vector<2xf32> to vector<2x1xf32>
      %109 = vector.broadcast %108 : vector<2x1xf32> to vector<2x128xf32>
      %110 = arith.cmpf oeq, %106, %109 : vector<2x128xf32>
      %c128_i32_44 = arith.constant 128 : i32
      %111 = vector.broadcast %c128_i32_44 : i32 to vector<2x128xi32>
      %112 = arith.select %110, %23, %111 : vector<2x128xi1>, vector<2x128xi32>
      %cst_45 = arith.constant dense<2147483647> : vector<2xi32>
      %113 = vector.multi_reduction <minsi>, %112, %cst_45 [1] : vector<2x128xi32> to vector<2xi32>
      %114 = vector.shape_cast %113 : vector<2xi32> to vector<2x1xi32>
      %115 = vector.broadcast %114 : vector<2x1xi32> to vector<2x128xi32>
      %116 = arith.cmpi eq, %23, %115 : vector<2x128xi32>
      %117 = arith.ori %104, %116 : vector<2x128xi1>
      %cst_46 = arith.constant -3.400000e+38 : f32
      %118 = vector.broadcast %cst_46 : f32 to vector<2x128xf32>
      %119 = arith.select %116, %118, %106 : vector<2x128xi1>, vector<2x128xf32>
      %cst_47 = arith.constant dense<0xFF800000> : vector<2xf32>
      %120 = vector.multi_reduction <maximumf>, %119, %cst_47 [1] : vector<2x128xf32> to vector<2xf32>
      %121 = vector.shape_cast %120 : vector<2xf32> to vector<2x1xf32>
      %122 = vector.broadcast %121 : vector<2x1xf32> to vector<2x128xf32>
      %123 = arith.cmpf oeq, %119, %122 : vector<2x128xf32>
      %c128_i32_48 = arith.constant 128 : i32
      %124 = vector.broadcast %c128_i32_48 : i32 to vector<2x128xi32>
      %125 = arith.select %123, %23, %124 : vector<2x128xi1>, vector<2x128xi32>
      %cst_49 = arith.constant dense<2147483647> : vector<2xi32>
      %126 = vector.multi_reduction <minsi>, %125, %cst_49 [1] : vector<2x128xi32> to vector<2xi32>
      %127 = vector.shape_cast %126 : vector<2xi32> to vector<2x1xi32>
      %128 = vector.broadcast %127 : vector<2x1xi32> to vector<2x128xi32>
      %129 = arith.cmpi eq, %23, %128 : vector<2x128xi32>
      %130 = arith.ori %117, %129 : vector<2x128xi1>
      %cst_50 = arith.constant 0.000000e+00 : f32
      %131 = vector.broadcast %cst_50 : f32 to vector<2x128xf32>
      %132 = arith.select %130, %22, %131 : vector<2x128xi1>, vector<2x128xf32>
      %c0_51 = arith.constant 0 : index
      %c0_52 = arith.constant 0 : index
      %133 = vector.load %arg7[%c0_51, %c0_52] : memref<2x128xf32, #tpu.memory_space<vmem>>, vector<2x128xf32>
      tpu.vector_store %arg7[%c0_51, %c0_52], %132 {strides = array<i32>} : memref<2x128xf32, #tpu.memory_space<vmem>>, vector<2x128xf32>,
    } else {
    }
    return
  }
  func.func @transform_0(%arg0: i32, %arg1: i32) -> (i32, i32) {
    %c0_i32 = arith.constant 0 : i32
    return %arg0, %arg1 : i32, i32
  }
  func.func @transform_1(%arg0: i32, %arg1: i32) -> (i32, i32) {
    %c0_i32 = arith.constant 0 : i32
    %c0_i32_0 = arith.constant 0 : i32
    return %arg1, %c0_i32 : i32, i32
  }
  func.func @transform_2(%arg0: i32, %arg1: i32) -> (i32, i32) {
    %c0_i32 = arith.constant 0 : i32
    %c0_i32_0 = arith.constant 0 : i32
    %c0_i32_1 = arith.constant 0 : i32
    return %c0_i32, %c0_i32_0 : i32, i32
  }
  func.func @transform_3(%arg0: i32, %arg1: i32) -> (i32, i32) {
    %c0_i32 = arith.constant 0 : i32
    %c0_i32_0 = arith.constant 0 : i32
    %c0_i32_1 = arith.constant 0 : i32
    return %c0_i32, %c0_i32_0 : i32, i32
  }
  func.func @transform_4(%arg0: i32, %arg1: i32) -> (i32, i32) {
    %c0_i32 = arith.constant 0 : i32
    %c0_i32_0 = arith.constant 0 : i32
    %c0_i32_1 = arith.constant 0 : i32
    return %c0_i32, %c0_i32_0 : i32, i32
  }
  func.func @transform_5(%arg0: i32, %arg1: i32) -> (i32, i32) {
    %c0_i32 = arith.constant 0 : i32
    %c0_i32_0 = arith.constant 0 : i32
    return %arg0, %c0_i32 : i32, i32
  }
}

</mosaic_0001>

<bundles_post_ra>
// kernel: tpu_custom_call.1
= control target key start
LH: loop header
LB: loop body
LE: loop exit
PB: predicated region body
PF: predicated region fallthrough
CT: control target
= control target key end

     0   :  { %10 = vsyncpa [#allocation4], 0  ;;  %s928_s0 = inlined_call_operand.hbm [shape: bf16[2,256], index: 0, kind: input, shape index: {}]   ;;  %s929_s1 = inlined_call_operand.hbm [shape: bf16[256,128], index: 1, kind: input, shape index: {}]   ;;  %s930_s2 = inlined_call_operand.vmem [shape: f32[1,128], index: 2, kind: input, shape index: {}]   ;;  %s931_s3 = inlined_call_operand.hbm [shape: bf16[128,128], index: 3, kind: input, shape index: {}]   ;;  %s932_s4 = inlined_call_operand.vmem [shape: f32[1,128], index: 4, kind: input, shape index: {}]   ;;  %s933_s5 = inlined_call_operand.hbm [shape: f32[2,128], index: 5, kind: output, shape index: {}]  }
   0x1   :  { %11 = vsyncpa [#allocation7], 0 }
   0x2   :  { %12 = vsyncpa [#allocation5], 0  ;;  %s792_s18 = smov [#allocation6]  }
   0x3   :  { %s28_s19 = sshll.u32 %s792_s18, 4  ;;  %s29_s19 = int_to_ptr.vmem [resolvable:$true] %s28_s19 }
   0x4   :  { %s714_s20 = scalar_lea.vmem %s29_s19, 2048  ;;  %p719_p1 = scmp.lt.s32.totalorder %s29_s19, %s29_s19 }
   0x5   :  { %p715_p0 = scmp.ne.s32.totalorder %s29_s19, %s714_s20  ;;  %p720_p2 = scmp.lt.s32.totalorder %s714_s20, %s714_s20 }
   0x7   :  { %p721_p3 = por %p720_p2, %p719_p1 }
   0x9   :  { %p722_p4 = pnand %p721_p3, %p715_p0 }
   0xb   :  { %725 = shalt.err (!%p722_p4)
}
   0xc   :  { %s793_s21 = smov 64   ;;  %s794_s22 = smov 4  }
   0xd   :  { %34 = dma.hbm_to_vmem [thread:$0]  %s929_s1, 2048, %s29_s19, [#allocation7], %s793_s21, %s793_s21, %s794_s22  }
   0xe   :  { %s795_s25 = smov [#allocation3]   ;;  %s796_s27 = smov [#allocation8]  }
   0xf   :  { %s19_s26 = sshll.u32 %s795_s25, 4  ;;  %s42_s28 = sshll.u32 %s796_s27, 4  ;;  %s20_s26 = int_to_ptr.vmem [resolvable:$true] %s19_s26  ;;  %s43_s28 = int_to_ptr.vmem [resolvable:$true] %s42_s28 }
  0x10   :  { %s734_s29 = scalar_lea.vmem %s20_s26, 32  ;;  %p739_p6 = scmp.lt.s32.totalorder %s20_s26, %s20_s26 }
  0x11   :  { %p735_p5 = scmp.ne.s32.totalorder %s20_s26, %s734_s29  ;;  %p740_p7 = scmp.lt.s32.totalorder %s734_s29, %s734_s29 }
  0x13   :  { %p741_p8 = por %p740_p7, %p739_p6 }
  0x15   :  { %p742_p9 = pnand %p741_p8, %p735_p5 }
  0x17   :  { %745 = shalt.err (!%p742_p9)
}
  0x18   :  { %22 = dma.hbm_to_vmem [thread:$0]  %s928_s0, 32, %s20_s26, [#allocation4]  }
  0x19   :  { %s754_s7 = scalar_lea.vmem %s43_s28, 1024  ;;  %p759_p11 = scmp.lt.s32.totalorder %s43_s28, %s43_s28 }
  0x1a   :  { %p755_p10 = scmp.ne.s32.totalorder %s43_s28, %s754_s7  ;;  %p760_p12 = scmp.lt.s32.totalorder %s754_s7, %s754_s7 }
  0x1c   :  { %p761_p13 = por %p760_p12, %p759_p11 }
  0x1e   :  { %p762_p0 = pnand %p761_p13, %p755_p10 }
  0x20   :  { %765 = shalt.err (!%p762_p0)
}
  0x21   :  { %48 = dma.hbm_to_vmem [thread:$0]  %s931_s3, 1024, %s43_s28, [#allocation7], %s793_s21, %s793_s21, %s794_s22  }
  0x22   :  { %786 = dma.done.wait [#allocation4], 32  }
  0x23   :  { %787 = vsyncadd [#allocation4], 4294967264 }
  0x24   :  { %788 = dma.done.wait [#allocation7], 3072  }
  0x25   :  { %789 = vsyncadd [#allocation7], 4294964224  ;;  %v680_v0 = vld [vmem:[#allocation6 + $0x78] sm:$0xff]   ;;  %v682_v2 = vld [vmem:[#allocation6 + $0x70] sm:$0xff]   ;;  %v797_v6 = vmov 1966171168   ;;  %v112_v8 = vlaneseq }
  0x26   :  { %v681_v1 = vld [vmem:[#allocation6 + $0x38] sm:$0xff]   ;;  %620 = vmatprep.subr.bf16.mxu0 %v680_v0  ;;  %v683_v3 = vld [vmem:[#allocation6 + $0x30] sm:$0xff]   ;;  %v684_v4 = vld [vmem:[#allocation6 + $0x68] sm:$0xff]   ;;  %v110_v7 = vunpack.c.l.s4 %v797_v6  ;;  %v798_v26 = vmov 0.0   ;;  %vm799_vm0 = vmmov 0   ;;  %vm392_vm2 = vcmask 1041408  }
  0x27   :  { %621 = vmatpush3.bf16.msra.mxu0 %v681_v1  ;;  %v685_v5 = vld [vmem:[#allocation6 + $0x28] sm:$0xff]   ;;  %v686_v9 = vld [vmem:[#allocation6 + $0x60] sm:$0xff]   ;;  %v113_v12 = vshrl.u32 %v112_v8, 7  ;;  %v688_v13 = vld [vmem:[#allocation6 + $0x58] sm:$0xff]   ;;  %651 = vmatprep.subr.bf16.mxu1 %v798_v26  ;;  %65 = vst [vmem:[#allocation2] sm:$0x3] %v798_v26 }
  0x28   :  { %622 = vmatprep.subr.bf16.mxu0 %v682_v2  ;;  %v687_v10 = vld [vmem:[#allocation6 + $0x20] sm:$0xff]   ;;  %v111_v11 = vunpack.c.0.s8 %v110_v7  ;;  %v689_v14 = vld [vmem:[#allocation6 + $0x18] sm:$0xff]   ;;  %v690_v15 = vld [vmem:[#allocation6 + $0x50] sm:$0xff]   ;;  %667 = vmatprep.mubr.msk.bf16.mxu1 %vm799_vm0, %v798_v26  ;;  %v845_v47 = vand.u32 127, %v112_v8 }
  0x29   :  { %v593_v17 = vld.sshfl [vmem:[#allocation3] sm:$0x11 pattern:$0x75316420]  ;;  %v691_v18 = vld [vmem:[#allocation6 + $0x10] sm:$0xff]   ;;  %v692_v20 = vld [vmem:[#allocation6 + $0x48] sm:$0xff]  }
  0x2a   :  { %v114_v16 = vsub.s32 %v111_v11, %v113_v12  ;;  %v108_v19 = vcombine.high %v593_v17, %v593_v17  ;;  %v693_v22 = vld [vmem:[#allocation6 + $0x8] sm:$0xff]   ;;  %v694_v23 = vld [vmem:[#allocation6 + $0x40] sm:$0xff]   ;;  %v696_v27 = vld [vmem:[#allocation8 + $0x38] sm:$0xff]   ;;  %vm390_vm1 = vcmp.lt.s32.totalorder %v845_v47, 32 }
  0x2b   :  { %623 = vmatpush3.bf16.msra.mxu0 %v683_v3  ;;  %v695_v24 = vld [vmem:[#allocation6] sm:$0xff]   ;;  %652 = vmatpush3.bf16.msra.mxu1 %v696_v27  ;;  %v697_v28 = vld [vmem:[#allocation8 + $0x30] sm:$0xff]   ;;  %v698_v29 = vld [vmem:[#allocation8 + $0x28] sm:$0xff]  }
  0x2c   :  { %624 = vmatprep.subr.bf16.mxu0 %v684_v4  ;;  %v122_v21 = vrot.slane %v108_v19, %v114_v16  ;;  %v115_v25 = vrot.slane %v593_v17, %v114_v16  ;;  %653 = vmatprep.subr.bf16.mxu1 %v798_v26  ;;  %v699_v30 = vld [vmem:[#allocation8 + $0x20] sm:$0xff]   ;;  %v700_v31 = vld [vmem:[#allocation8 + $0x18] sm:$0xff]   ;;  %v701_v32 = vld [vmem:[#allocation8 + $0x10] sm:$0xff]  }
  0x2d   :  { %v702_v33 = vld [vmem:[#allocation8 + $0x8] sm:$0xff]   ;;  %v703_v34 = vld [vmem:[#allocation8] sm:$0xff]   ;;  %v610_v42 = vld [vmem:[%s930_s2] ss:$0 sm:$0xff]  ;;  %s800_s2 = smov [#allocation9]  }
  0x2e   :  { %253 = vmatprep.mubr.bf16.mxu0 %v122_v21  ;;  %v66_v36 = vld [vmem:[#allocation2] sm:$0x3] }
  0x2f   :  { %625 = vmatpush3.bf16.msra.mxu0 %v685_v5  ;;  %654 = vmatpush3.bf16.msra.mxu1 %v697_v28  ;;  %v611_v48 = vld [vmem:[%s932_s4] ss:$0 sm:$0xff]  ;;  %s583_s4 = sshll.u32 %s800_s2, 4  ;;  %s584_s4 = int_to_ptr.vmem [resolvable:$true] %s583_s4 }
  0x30   :  { %626 = vmatprep.subr.bf16.mxu0 %v686_v9  ;;  %655 = vmatprep.subr.bf16.mxu1 %v798_v26  ;;  %s766_s11 = scalar_lea.vmem %s584_s4, 32  ;;  %p771_p2 = scmp.lt.s32.totalorder %s584_s4, %s584_s4 }
  0x31   :  { %p767_p1 = scmp.ne.s32.totalorder %s584_s4, %s766_s11  ;;  %p772_p3 = scmp.lt.s32.totalorder %s766_s11, %s766_s11 }
  0x33   :  { %627 = vmatpush3.bf16.msra.mxu0 %v687_v10  ;;  %656 = vmatpush3.bf16.msra.mxu1 %v698_v29  ;;  %p773_p4 = por %p772_p3, %p771_p2 }
  0x34   :  { %628 = vmatprep.subr.bf16.mxu0 %v688_v13  ;;  %657 = vmatprep.subr.bf16.mxu1 %v798_v26 }
  0x35   :  { %p774_p5 = pnand %p773_p4, %p767_p1 }
  0x37   :  { %629 = vmatpush3.bf16.msra.mxu0 %v689_v14  ;;  %658 = vmatpush3.bf16.msra.mxu1 %v699_v30 }
  0x38   :  { %630 = vmatprep.subr.bf16.mxu0 %v690_v15  ;;  %659 = vmatprep.subr.bf16.mxu1 %v798_v26 }
  0x3b   :  { %631 = vmatpush3.bf16.msra.mxu0 %v691_v18  ;;  %660 = vmatpush3.bf16.msra.mxu1 %v700_v31 }
  0x3c   :  { %632 = vmatprep.subr.bf16.mxu0 %v692_v20  ;;  %661 = vmatprep.subr.bf16.mxu1 %v798_v26 }
  0x3f   :  { %633 = vmatpush3.bf16.msra.mxu0 %v693_v22  ;;  %662 = vmatpush3.bf16.msra.mxu1 %v701_v32 }
  0x40   :  { %634 = vmatprep.subr.bf16.mxu0 %v694_v23  ;;  %663 = vmatprep.subr.bf16.mxu1 %v798_v26 }
  0x43   :  { %635 = vmatpush3.bf16.msra.mxu0 %v695_v24  ;;  %664 = vmatpush3.bf16.msra.mxu1 %v702_v33 }
  0x44   :  { %665 = vmatprep.subr.bf16.mxu1 %v798_v26 }
  0x46   :  { %254 = vmatmul.mubr.bf16.vlgmr.msra.gmra.mxu0 %v115_v25 }
  0x47   :  { %666 = vmatpush3.bf16.msra.mxu1 %v703_v34 }
 0x106   :  { %v636_v35 = vpop.f32.mrf.mxu0 }
 0x108   :  { %v637_v37 = vpop.f32.mrf.mxu0 }
 0x109   :  { %v638_v38 = vadd.f32 %v637_v37, %v636_v35 }
 0x10a   :  { %v639_v39 = vpop.f32.mrf.mxu0 }
 0x10b   :  { %v261_v40 = vadd.f32 %v638_v38, %v66_v36 }
 0x10c   :  { %v640_v41 = vpop.f32.mrf.mxu0 }
 0x10d   :  { %262 = vst [vmem:[#allocation2] sm:$0x3] %v261_v40 }
 0x114   :  { %v266_v43 = vld [vmem:[#allocation2] sm:$0x3] }
 0x115   :  { %v274_v44 = vadd.f32 %v610_v42, %v266_v43 }
 0x117   :  { %704 = vtanh.f32 %v274_v44 }
 0x124   :  { %v705_v45 = vpop.eup %704 }
 0x125   :  { %v276_v46 = vpack.c.bf16 %v705_v45, %v705_v45 }
 0x127   :  { %668 = vmatmul.mubr.bf16.vlgmr.msra.gmra.mxu1 %v276_v46 }
 0x1e7   :  { %v382_v49 = vpop.f32.mrf.mxu1 }
 0x1e8   :  { %v851_v50 = vadd.f32 %v611_v48, %v382_v49 }
 0x1e9   :  { %v669_v51 = vpop.f32.mrf.mxu1 }
 0x1ea   :  { %v391_v52 = vsel %vm390_vm1, %v851_v50, -3.4e+38 }
 0x1eb   :  { %v385_v53 = vpop.f32.mrf.mxu1  ;;  %v393_v54 = vsel %vm392_vm2, %v391_v52, -inf }
 0x1ec   :  { %394 = vmax.xlane.f32.xlu0 %v393_v54 }
 0x1ed   :  { %v670_v55 = vpop.f32.mrf.mxu1 }
 0x275   :  { %v395_v56 = vpop.xlane.xlu0 %394 }
 0x276   :  { %vm396_vm3 = vcmp.eq.f32.partialorder %v391_v52, %v395_v56 }
 0x277   :  { %v397_v57 = vsel %vm396_vm3, %v845_v47, 128 }
 0x278   :  { %v398_v58 = vsel %vm392_vm2, %v397_v57, 2147483647 }
 0x279   :  { %v400_v59 = vshra.s32 %v398_v58, 16  ;;  %v399_v61 = vand.u32 65535, %v398_v58 }
 0x27b   :  { %v402_v60 = vcvt.s32.f32 %v400_v59  ;;  %v401_v63 = vcvt.s32.f32 %v399_v61 }
 0x27d   :  { %403 = vmin.xlane.f32.xlu0 %v402_v60 }
 0x306   :  { %v404_v62 = vpop.xlane.xlu0 %403 }
 0x307   :  { %vm405_vm4 = vcmp.eq.f32.partialorder %v402_v60, %v404_v62  ;;  %v410_v1 = vcvt.f32.s32 %v404_v62 }
 0x308   :  { %v406_v0 = vsel %vm405_vm4, %v401_v63, inf }
 0x309   :  { %407 = vmin.xlane.f32.xlu1 %v406_v0  ;;  %v411_v3 = vshll.u32 %v410_v1, 16 }
 0x392   :  { %v408_v2 = vpop.xlane.xlu1 %407 }
 0x393   :  { %v409_v4 = vcvt.f32.s32 %v408_v2 }
 0x395   :  { %v412_v5 = vadd.s32 %v411_v3, %v409_v4 }
 0x397   :  { %vm413_vm5 = vcmp.eq.s32.totalorder %v845_v47, %v412_v5 }
 0x398   :  { %v414_v6 = vsel %vm413_vm5, -3.4e+38, %v391_v52 }
 0x399   :  { %v415_v7 = vsel %vm392_vm2, %v414_v6, -inf }
 0x39a   :  { %416 = vmax.xlane.f32.xlu1 %v415_v7 }
 0x423   :  { %v417_v8 = vpop.xlane.xlu1 %416 }
 0x424   :  { %vm418_vm6 = vcmp.eq.f32.partialorder %v414_v6, %v417_v8 }
 0x425   :  { %v419_v9 = vsel %vm418_vm6, %v845_v47, 128 }
 0x426   :  { %v420_v10 = vsel %vm392_vm2, %v419_v9, 2147483647 }
 0x427   :  { %v422_v11 = vshra.s32 %v420_v10, 16  ;;  %v421_v13 = vand.u32 65535, %v420_v10 }
 0x429   :  { %v424_v12 = vcvt.s32.f32 %v422_v11  ;;  %v423_v15 = vcvt.s32.f32 %v421_v13 }
 0x42b   :  { %425 = vmin.xlane.f32.xlu0 %v424_v12 }
 0x4b4   :  { %v426_v14 = vpop.xlane.xlu0 %425 }
 0x4b5   :  { %vm427_vm7 = vcmp.eq.f32.partialorder %v424_v12, %v426_v14  ;;  %v432_v17 = vcvt.f32.s32 %v426_v14 }
 0x4b6   :  { %v428_v16 = vsel %vm427_vm7, %v423_v15, inf }
 0x4b7   :  { %429 = vmin.xlane.f32.xlu1 %v428_v16  ;;  %v433_v19 = vshll.u32 %v432_v17, 16 }
 0x540   :  { %v430_v18 = vpop.xlane.xlu1 %429 }
 0x541   :  { %v431_v20 = vcvt.f32.s32 %v430_v18 }
 0x543   :  { %v434_v21 = vadd.s32 %v433_v19, %v431_v20 }
 0x545   :  { %vm435_vm8 = vcmp.eq.s32.totalorder %v845_v47, %v434_v21 }
 0x546   :  { %v437_v22 = vsel %vm435_vm8, -3.4e+38, %v414_v6  ;;  %vm436_vm11 = vmor %vm413_vm5, %vm435_vm8 }
 0x547   :  { %v438_v23 = vsel %vm392_vm2, %v437_v22, -inf }
 0x548   :  { %439 = vmax.xlane.f32.xlu0 %v438_v23 }
 0x5d1   :  { %v440_v24 = vpop.xlane.xlu0 %439 }
 0x5d2   :  { %vm441_vm9 = vcmp.eq.f32.partialorder %v437_v22, %v440_v24 }
 0x5d3   :  { %v442_v25 = vsel %vm441_vm9, %v845_v47, 128 }
 0x5d4   :  { %v443_v26 = vsel %vm392_vm2, %v442_v25, 2147483647 }
 0x5d5   :  { %v445_v27 = vshra.s32 %v443_v26, 16  ;;  %v444_v29 = vand.u32 65535, %v443_v26 }
 0x5d7   :  { %v447_v28 = vcvt.s32.f32 %v445_v27  ;;  %v446_v31 = vcvt.s32.f32 %v444_v29 }
 0x5d9   :  { %448 = vmin.xlane.f32.xlu1 %v447_v28 }
 0x662   :  { %v449_v30 = vpop.xlane.xlu1 %448 }
 0x663   :  { %vm450_vm10 = vcmp.eq.f32.partialorder %v447_v28, %v449_v30  ;;  %v455_v33 = vcvt.f32.s32 %v449_v30 }
 0x664   :  { %v451_v32 = vsel %vm450_vm10, %v446_v31, inf }
 0x665   :  { %452 = vmin.xlane.f32.xlu0 %v451_v32  ;;  %v456_v35 = vshll.u32 %v455_v33, 16 }
 0x6ee   :  { %v453_v34 = vpop.xlane.xlu0 %452 }
 0x6ef   :  { %v454_v36 = vcvt.f32.s32 %v453_v34 }
 0x6f1   :  { %v457_v37 = vadd.s32 %v456_v35, %v454_v36 }
 0x6f3   :  { %vm458_vm12 = vcmp.eq.s32.totalorder %v845_v47, %v457_v37 }
 0x6f4   :  { %v460_v38 = vsel %vm458_vm12, -3.4e+38, %v437_v22  ;;  %vm874_vm13 = vmor %vm436_vm11, %vm458_vm12 }
 0x6f5   :  { %v461_v40 = vsel %vm392_vm2, %v460_v38, -inf }
 0x6f6   :  { %462 = vmax.xlane.f32.xlu1 %v461_v40 }
 0x77f   :  { %v463_v41 = vpop.xlane.xlu1 %462 }
 0x780   :  { %vm464_vm14 = vcmp.eq.f32.partialorder %v460_v38, %v463_v41 }
 0x781   :  { %v465_v42 = vsel %vm464_vm14, %v845_v47, 128 }
 0x782   :  { %v466_v43 = vsel %vm392_vm2, %v465_v42, 2147483647 }
 0x783   :  { %v468_v44 = vshra.s32 %v466_v43, 16  ;;  %v467_v46 = vand.u32 65535, %v466_v43 }
 0x785   :  { %v470_v45 = vcvt.s32.f32 %v468_v44  ;;  %v469_v49 = vcvt.s32.f32 %v467_v46 }
 0x787   :  { %471 = vmin.xlane.f32.xlu0 %v470_v45 }
 0x810   :  { %v472_v48 = vpop.xlane.xlu0 %471 }
 0x811   :  { %vm473_vm15 = vcmp.eq.f32.partialorder %v470_v45, %v472_v48  ;;  %v478_v52 = vcvt.f32.s32 %v472_v48 }
 0x812   :  { %v474_v51 = vsel %vm473_vm15, %v469_v49, inf }
 0x813   :  { %475 = vmin.xlane.f32.xlu1 %v474_v51  ;;  %v479_v54 = vshll.u32 %v478_v52, 16 }
 0x89c   :  { %v476_v53 = vpop.xlane.xlu1 %475 }
 0x89d   :  { %v477_v55 = vcvt.f32.s32 %v476_v53 }
 0x89f   :  { %v480_v56 = vadd.s32 %v479_v54, %v477_v55 }
 0x8a1   :  { %vm481_vm0 = vcmp.eq.s32.totalorder %v845_v47, %v480_v56 }
 0x8a2   :  { %v483_v57 = vsel %vm481_vm0, -3.4e+38, %v460_v38  ;;  %vm884_vm1 = vmor %vm874_vm13, %vm481_vm0 }
 0x8a3   :  { %v484_v59 = vsel %vm392_vm2, %v483_v57, -inf }
 0x8a4   :  { %485 = vmax.xlane.f32.xlu0 %v484_v59 }
 0x92d   :  { %v486_v60 = vpop.xlane.xlu0 %485 }
 0x92e   :  { %vm487_vm3 = vcmp.eq.f32.partialorder %v483_v57, %v486_v60 }
 0x92f   :  { %v488_v61 = vsel %vm487_vm3, %v845_v47, 128 }
 0x930   :  { %v489_v62 = vsel %vm392_vm2, %v488_v61, 2147483647 }
 0x931   :  { %v491_v63 = vshra.s32 %v489_v62, 16  ;;  %v490_v1 = vand.u32 65535, %v489_v62 }
 0x933   :  { %v493_v0 = vcvt.s32.f32 %v491_v63  ;;  %v492_v3 = vcvt.s32.f32 %v490_v1 }
 0x935   :  { %494 = vmin.xlane.f32.xlu1 %v493_v0 }
 0x9be   :  { %v495_v2 = vpop.xlane.xlu1 %494 }
 0x9bf   :  { %vm496_vm4 = vcmp.eq.f32.partialorder %v493_v0, %v495_v2  ;;  %v501_v5 = vcvt.f32.s32 %v495_v2 }
 0x9c0   :  { %v497_v4 = vsel %vm496_vm4, %v492_v3, inf }
 0x9c1   :  { %498 = vmin.xlane.f32.xlu0 %v497_v4  ;;  %v502_v7 = vshll.u32 %v501_v5, 16 }
 0xa4a   :  { %v499_v6 = vpop.xlane.xlu0 %498 }
 0xa4b   :  { %v500_v8 = vcvt.f32.s32 %v499_v6 }
 0xa4d   :  { %v503_v9 = vadd.s32 %v502_v7, %v500_v8 }
 0xa4f   :  { %vm504_vm5 = vcmp.eq.s32.totalorder %v845_v47, %v503_v9 }
 0xa50   :  { %v506_v10 = vsel %vm504_vm5, -3.4e+38, %v483_v57  ;;  %vm894_vm6 = vmor %vm884_vm1, %vm504_vm5 }
 0xa51   :  { %v507_v12 = vsel %vm392_vm2, %v506_v10, -inf }
 0xa52   :  { %508 = vmax.xlane.f32.xlu1 %v507_v12 }
 0xadb   :  { %v509_v13 = vpop.xlane.xlu1 %508 }
 0xadc   :  { %vm510_vm7 = vcmp.eq.f32.partialorder %v506_v10, %v509_v13 }
 0xadd   :  { %v511_v14 = vsel %vm510_vm7, %v845_v47, 128 }
 0xade   :  { %v512_v15 = vsel %vm392_vm2, %v511_v14, 2147483647 }
 0xadf   :  { %v514_v16 = vshra.s32 %v512_v15, 16  ;;  %v513_v18 = vand.u32 65535, %v512_v15 }
 0xae1   :  { %v516_v17 = vcvt.s32.f32 %v514_v16  ;;  %v515_v20 = vcvt.s32.f32 %v513_v18 }
 0xae3   :  { %517 = vmin.xlane.f32.xlu0 %v516_v17 }
 0xb6c   :  { %v518_v19 = vpop.xlane.xlu0 %517 }
 0xb6d   :  { %vm519_vm8 = vcmp.eq.f32.partialorder %v516_v17, %v518_v19  ;;  %v524_v22 = vcvt.f32.s32 %v518_v19 }
 0xb6e   :  { %v520_v21 = vsel %vm519_vm8, %v515_v20, inf }
 0xb6f   :  { %521 = vmin.xlane.f32.xlu1 %v520_v21  ;;  %v525_v24 = vshll.u32 %v524_v22, 16 }
 0xbf8   :  { %v522_v23 = vpop.xlane.xlu1 %521 }
 0xbf9   :  { %v523_v25 = vcvt.f32.s32 %v522_v23 }
 0xbfb   :  { %v526_v26 = vadd.s32 %v525_v24, %v523_v25 }
 0xbfd   :  { %vm527_vm9 = vcmp.eq.s32.totalorder %v845_v47, %v526_v26 }
 0xbfe   :  { %v529_v27 = vsel %vm527_vm9, -3.4e+38, %v506_v10  ;;  %vm904_vm10 = vmor %vm894_vm6, %vm527_vm9 }
 0xbff   :  { %v530_v29 = vsel %vm392_vm2, %v529_v27, -inf }
 0xc00   :  { %531 = vmax.xlane.f32.xlu0 %v530_v29 }
 0xc89   :  { %v532_v30 = vpop.xlane.xlu0 %531 }
 0xc8a   :  { %vm533_vm11 = vcmp.eq.f32.partialorder %v529_v27, %v532_v30 }
 0xc8b   :  { %v534_v31 = vsel %vm533_vm11, %v845_v47, 128 }
 0xc8c   :  { %v535_v32 = vsel %vm392_vm2, %v534_v31, 2147483647 }
 0xc8d   :  { %v537_v33 = vshra.s32 %v535_v32, 16  ;;  %v536_v35 = vand.u32 65535, %v535_v32 }
 0xc8f   :  { %v539_v34 = vcvt.s32.f32 %v537_v33  ;;  %v538_v37 = vcvt.s32.f32 %v536_v35 }
 0xc91   :  { %540 = vmin.xlane.f32.xlu1 %v539_v34 }
 0xd1a   :  { %v541_v36 = vpop.xlane.xlu1 %540 }
 0xd1b   :  { %vm542_vm12 = vcmp.eq.f32.partialorder %v539_v34, %v541_v36  ;;  %v547_v39 = vcvt.f32.s32 %v541_v36 }
 0xd1c   :  { %v543_v38 = vsel %vm542_vm12, %v538_v37, inf }
 0xd1d   :  { %544 = vmin.xlane.f32.xlu0 %v543_v38  ;;  %v548_v41 = vshll.u32 %v547_v39, 16 }
 0xda6   :  { %v545_v40 = vpop.xlane.xlu0 %544 }
 0xda7   :  { %v546_v42 = vcvt.f32.s32 %v545_v40 }
 0xda9   :  { %v549_v43 = vadd.s32 %v548_v41, %v546_v42 }
 0xdab   :  { %vm550_vm13 = vcmp.eq.s32.totalorder %v845_v47, %v549_v43 }
 0xdac   :  { %v552_v44 = vsel %vm550_vm13, -3.4e+38, %v529_v27  ;;  %vm914_vm14 = vmor %vm904_vm10, %vm550_vm13 }
 0xdad   :  { %v553_v46 = vsel %vm392_vm2, %v552_v44, -inf }
 0xdae   :  { %554 = vmax.xlane.f32.xlu1 %v553_v46 }
 0xe37   :  { %v555_v48 = vpop.xlane.xlu1 %554 }
 0xe38   :  { %vm556_vm15 = vcmp.eq.f32.partialorder %v552_v44, %v555_v48 }
 0xe39   :  { %v557_v49 = vsel %vm556_vm15, %v845_v47, 128 }
 0xe3a   :  { %v558_v51 = vsel %vm392_vm2, %v557_v49, 2147483647 }
 0xe3b   :  { %v560_v52 = vshra.s32 %v558_v51, 16  ;;  %v559_v54 = vand.u32 65535, %v558_v51 }
 0xe3d   :  { %v562_v53 = vcvt.s32.f32 %v560_v52  ;;  %v561_v56 = vcvt.s32.f32 %v559_v54 }
 0xe3f   :  { %563 = vmin.xlane.f32.xlu0 %v562_v53 }
 0xec8   :  { %v564_v55 = vpop.xlane.xlu0 %563 }
 0xec9   :  { %vm565_vm0 = vcmp.eq.f32.partialorder %v562_v53, %v564_v55  ;;  %v570_v58 = vcvt.f32.s32 %v564_v55 }
 0xeca   :  { %v566_v57 = vsel %vm565_vm0, %v561_v56, inf }
 0xecb   :  { %567 = vmin.xlane.f32.xlu1 %v566_v57  ;;  %v571_v60 = vshll.u32 %v570_v58, 16 }
 0xf54   :  { %v568_v59 = vpop.xlane.xlu1 %567 }
 0xf55   :  { %v569_v61 = vcvt.f32.s32 %v568_v59 }
 0xf57   :  { %v572_v62 = vadd.s32 %v571_v60, %v569_v61 }
 0xf59   :  { %vm573_vm1 = vcmp.eq.s32.totalorder %v845_v47, %v572_v62 }
 0xf5a   :  { %vm574_vm2 = vmor %vm914_vm14, %vm573_vm1 }
 0xf5b   :  { %v575_v63 = vsel %vm574_vm2, %v851_v50, 0.0 }
 0xf5c   :  { %576 = vst [vmem:[#allocation9] sm:$0x3] %v575_v63 }
 0xf5d   :  { %777 = shalt.err (!%p774_p5)
}
 0xf5e   :  { %586 = dma.vmem_to_hbm [thread:$0]  %s584_s4, 32, %s933_s5, [#allocation5]  }
 0xf5f   :  { %790 = dma.done.wait [#allocation5], 32  }
 0xf60   :  { %791 = vsyncadd [#allocation5], 4294967264 }
 0xf61   :  { %590 = vsyncpa [#allocation4], 1 }
 0xf62   :  { %591 = vsyncpa [#allocation7], 1 }
 0xf63   :  { %592 = vsyncpa [#allocation5], 1 }

</bundles_post_ra>
